<compile_context>
chip_gen: v7x
topology: tpu7x:2x2x1
jax: 0.10.0
libtpu: 0.0.40
codegen_flags: <defaults>
</compile_context>

<pallas_src>
import functools

import jax
import jax.numpy as jnp
from jax.experimental import pallas as pl
from jax.experimental.pallas import tpu as pltpu

_SUBLANE = 8
_LANES = 128
_MAX_LANE_BLOCK = 1024             # max column tile (multiple of 128)
_TARGET_BLOCK_ELEMS = 512 * 1024   # ~2 MiB f32 per input block
_PALLAS_MIN_ELEMS = 1 << 15        # below this, plain XLA is faster


def _round_up(x: int, m: int) -> int:
    return -(-x // m) * m


def _pick_blocks(rows: int, cols: int):
    """Choose (tm, tn) respecting the (8,128) layout rules, with >=2 row blocks
    when possible so the parallel axis can shard across v7x's two TensorCores."""
    if cols >= _LANES:
        tn = min(_MAX_LANE_BLOCK, (cols // _LANES) * _LANES)
    else:
        tn = cols                      # full-dim column block (forced-Pallas only)
    tm = max(_SUBLANE, (_TARGET_BLOCK_ELEMS // max(tn, 1)) // _SUBLANE * _SUBLANE)
    if tm >= rows:
        if rows <= _SUBLANE:
            tm = rows                  # full-dim row block (tiny inputs)
        else:
            # Split into ~2 row blocks -> megacore sharding on v7x.
            tm = max(_SUBLANE, _round_up(-(-rows // 2), _SUBLANE))
    return tm, tn


def _vol_stats_kernel(pred_ref, tgt_ref,
                      sp_out, sp2_out, st_out, st2_out, sd2_out,
                      shp_s, sht_s, sp_s, sp2_s, st_s, st2_s, sd2_s,
                      *, rows, cols, tm, tn, lanes):
    """Per-row sums: [sum p', sum p'^2, sum t', sum t'^2, sum (p-t)^2], where
    p' = p - p[row, 0] and t' = t - t[row, 0] (shift-invariant variance)."""
    i = pl.program_id(0)
    j = pl.program_id(1)
    n_i = pl.num_programs(0)
    n_j = pl.num_programs(1)
    chunks = tn // lanes

    # Per-row shift captured once per row block (column 0 is always valid since
    # tn <= cols).  Stored pre-broadcast so the hot loop never re-broadcasts.
    @pl.when(j == 0)
    def _():
        p0 = pred_ref[:, 0:lanes].astype(jnp.float32)
        t0 = tgt_ref[:, 0:lanes].astype(jnp.float32)
        shp_s[...] = jnp.broadcast_to(p0[:, 0:1], (tm, lanes))
        sht_s[...] = jnp.broadcast_to(t0[:, 0:1], (tm, lanes))

    need_row_mask = (rows % tm) != 0
    need_col_mask = (cols % tn) != 0

    def partials(masked):
        """(tm, lanes) partial sums over this tile's columns; lane c holds the
        sum over tile columns {c, c+lanes, c+2*lanes, ...}.  Pure VPU work."""
        shp = shp_s[...]
        sht = sht_s[...]
        row_mask = None
        if masked and need_row_mask:
            rid = jax.lax.broadcasted_iota(jnp.int32, (tm, lanes), 0) + i * tm
            row_mask = rid < rows
        acc = None
        for c in range(chunks):
            lo = c * lanes
            p = pred_ref[:, lo:lo + lanes].astype(jnp.float32)
            t = tgt_ref[:, lo:lo + lanes].astype(jnp.float32)
            d = p - t
            ps = p - shp
            ts = t - sht
            if masked:
                m = row_mask
                if need_col_mask:
                    cid = (jax.lax.broadcasted_iota(jnp.int32, (tm, lanes), 1)
                           + j * tn + lo)
                    cm = cid < cols
                    m = cm if m is None else m & cm
                if m is not None:
                    ps = jnp.where(m, ps, 0.0)
                    ts = jnp.where(m, ts, 0.0)
                    d = jnp.where(m, d, 0.0)
            vals = (ps, ps * ps, ts, ts * ts, d * d)
            acc = vals if acc is None else tuple(a + v for a, v in zip(acc, vals))
        return acc

    s_refs = (sp_s, sp2_s, st_s, st2_s, sd2_s)

    def accumulate(vals):
        @pl.when(j == 0)
        def _():
            for r, v in zip(s_refs, vals):
                r[...] = v

        @pl.when(j != 0)
        def _():
            for r, v in zip(s_refs, vals):
                r[...] += v

    if not (need_row_mask or need_col_mask):
        accumulate(partials(False))
    else:
        conds = []
        if need_row_mask:
            conds.append(i == n_i - 1)
        if need_col_mask:
            conds.append(j == n_j - 1)
        edge = conds[0] if len(conds) == 1 else jnp.logical_or(conds[0], conds[1])

        @pl.when(edge)
        def _():
            accumulate(partials(True))

        @pl.when(jnp.logical_not(edge))
        def _():
            accumulate(partials(False))

    # One cross-lane (XLU) reduce per stat, once per row block; outputs stored
    # only here (no per-step masked narrow stores).
    @pl.when(j == n_j - 1)
    def _():
        sp_out[...] = jnp.sum(sp_s[...], axis=1, keepdims=True)
        sp2_out[...] = jnp.sum(sp2_s[...], axis=1, keepdims=True)
        st_out[...] = jnp.sum(st_s[...], axis=1, keepdims=True)
        st2_out[...] = jnp.sum(st2_s[...], axis=1, keepdims=True)
        sd2_out[...] = jnp.sum(sd2_s[...], axis=1, keepdims=True)


def _row_stats(pred2d: jax.Array, target2d: jax.Array,
               block_rows=None, block_cols=None):
    """Pallas reduction: per-row sums needed for mse + unbiased std."""
    rows, cols = pred2d.shape
    tm, tn = _pick_blocks(rows, cols)
    if block_rows is not None:
        tm = block_rows
    if block_cols is not None:
        tn = block_cols
    lanes = _LANES if tn % _LANES == 0 else tn

    grid = (pl.cdiv(rows, tm), pl.cdiv(cols, tn))
    kernel = functools.partial(_vol_stats_kernel, rows=rows, cols=cols,
                               tm=tm, tn=tn, lanes=lanes)

    stat_shape = jax.ShapeDtypeStruct((rows, 1), jnp.float32)
    stat_spec = pl.BlockSpec((tm, 1), lambda i, j: (i, 0))

    return pl.pallas_call(
        kernel,
        out_shape=(stat_shape,) * 5,
        grid_spec=pltpu.PrefetchScalarGridSpec(
            num_scalar_prefetch=0,
            grid=grid,
            in_specs=[pl.BlockSpec((tm, tn), lambda i, j: (i, j))] * 2,
            out_specs=[stat_spec] * 5,
            scratch_shapes=[pltpu.VMEM((tm, lanes), jnp.float32)] * 7,
        ),
        compiler_params=pltpu.CompilerParams(
            dimension_semantics=("parallel", "arbitrary")),
    )(pred2d, target2d)


def _loss_from_stats(stats, rows: int, cols: int, vol_weight: float):
    sum_p, sum_p2, sum_t, sum_t2, sum_d2 = (s[:, 0] for s in stats)
    n = jnp.float32(rows * cols)
    mse = jnp.sum(sum_d2) / n

    colsf = jnp.float32(cols)
    # torch.std default is unbiased (ddof=1).  For cols == 1 torch returns NaN;
    # we clamp the denominator to 1 instead (documented behavioral difference).
    denom = jnp.float32(max(cols - 1, 1))
    var_p = jnp.maximum(sum_p2 - sum_p * sum_p / colsf, 0.0) / denom
    var_t = jnp.maximum(sum_t2 - sum_t * sum_t / colsf, 0.0) / denom
    vol_loss = jnp.mean(jnp.square(jnp.sqrt(var_p) - jnp.sqrt(var_t)))
    return mse + jnp.float32(vol_weight) * vol_loss


def _reference(pred, target, vol_weight):
    """Pure-JAX reference mirroring the PyTorch module."""
    p = pred.astype(jnp.float32)
    t = target.astype(jnp.float32)
    mse = jnp.mean(jnp.square(p - t))
    pv = jnp.std(p, axis=1, ddof=1)
    tv = jnp.std(t, axis=1, ddof=1)
    return mse + vol_weight * jnp.mean(jnp.square(pv - tv))


@functools.partial(jax.jit,
                   static_argnames=("vol_weight", "use_pallas",
                                    "block_rows", "block_cols"))
def volatility_loss(pred: jax.Array, target: jax.Array,
                    vol_weight: float = 0.2, use_pallas=None,
                    block_rows=None, block_cols=None) -> jax.Array:
    """JAX/Pallas equivalent of VolatilityLoss.forward."""
    assert pred.shape == target.shape, "pred/target shape mismatch"
    if pred.ndim < 2:
        raise ValueError("VolatilityLoss expects at least 2-D input (batch, horizon, ...)")

    if pred.ndim == 2:
        p2d, t2d = pred, target          # std axis already last -> no wrapper copies
    else:
        T = pred.shape[1]
        p2d = jnp.moveaxis(pred, 1, -1).reshape(-1, T)
        t2d = jnp.moveaxis(target, 1, -1).reshape(-1, T)

    rows, cols = p2d.shape
    if use_pallas is None:
        # Narrow-cols / tiny-input escape hatch: XLA's fused reduction wins there.
        use_pallas = (rows * cols) >= _PALLAS_MIN_ELEMS and cols >= _LANES
    if not use_pallas:
        return _reference(pred, target, vol_weight)

    stats = _row_stats(p2d, t2d, block_rows=block_rows, block_cols=block_cols)
    return _loss_from_stats(stats, rows, cols, vol_weight)


if __name__ == "__main__":
    key = jax.random.PRNGKey(0)
    vol_weight = 0.2

    cases = [
        # (shape, dtype, mean offset, block overrides)
        ((16, 256), jnp.float32, 0.0, {}),                    # 2 row blocks, 2 lane chunks
        ((50, 200), jnp.float32, 0.0, {}),                    # ragged rows AND cols -> edge masks
        ((24, 384), jnp.bfloat16, 0.0, {}),                   # bf16 path, ragged rows
        ((32, 512), jnp.float32, 10.0, dict(block_rows=16,    # multi-block grid, large-mean
                                            block_cols=256)), # exercises the per-row shift
        ((2, 128, 4), jnp.float32, 0.0, {}),                  # >2-D path (std over dim=1)
    ]

    ok = True
    for shape, dtype, offset, blocks in cases:
        key, kp, kt = jax.random.split(key, 3)
        pred = (jax.random.normal(kp, shape) * 0.05 + offset).astype(dtype)
        target = (jax.random.normal(kt, shape) * 0.05 + offset).astype(dtype)

        out = volatility_loss(pred, target, vol_weight=vol_weight,
                              use_pallas=True, **blocks)
        out = jax.block_until_ready(out)
        ref = _reference(pred, target, vol_weight)

        if not jnp.allclose(out, ref, rtol=1e-4, atol=1e-6):
            ok = False
            print(f"MISMATCH shape={shape} dtype={jnp.dtype(dtype).name}: "
                  f"kernel={out} ref={ref}")

    if ok:
        print("KERNEL_OK")
</pallas_src>

<mosaic_0001>
module attributes {stable_mosaic.version = 11 : i64} {
  func.func @_vol_stats_kernel(%arg0: i32, %arg1: i32, %arg2: memref<8x256xf32, #tpu.memory_space<vmem>>, %arg3: memref<8x256xf32, #tpu.memory_space<vmem>>, %arg4: memref<8x1xf32, #tpu.memory_space<vmem>>, %arg5: memref<8x1xf32, #tpu.memory_space<vmem>>, %arg6: memref<8x1xf32, #tpu.memory_space<vmem>>, %arg7: memref<8x1xf32, #tpu.memory_space<vmem>>, %arg8: memref<8x1xf32, #tpu.memory_space<vmem>>, %arg9: memref<8x128xf32, #tpu.memory_space<vmem>>, %arg10: memref<8x128xf32, #tpu.memory_space<vmem>>, %arg11: memref<8x128xf32, #tpu.memory_space<vmem>>, %arg12: memref<8x128xf32, #tpu.memory_space<vmem>>, %arg13: memref<8x128xf32, #tpu.memory_space<vmem>>, %arg14: memref<8x128xf32, #tpu.memory_space<vmem>>, %arg15: memref<8x128xf32, #tpu.memory_space<vmem>>) attributes {dimension_semantics = [#tpu.dimension_semantics<parallel>, #tpu.dimension_semantics<arbitrary>], iteration_bounds = array<i64: 2, 1>, scalar_prefetch = 0 : i64, scratch_operands = 7 : i64, tpu.core_type = #tpu.core_type<tc>, window_params = [{transform_indices = @transform_0, window_bounds = array<i64: 8, 256>}, {transform_indices = @transform_1, window_bounds = array<i64: 8, 256>}, {transform_indices = @transform_2, window_bounds = array<i64: 8, 1>}, {transform_indices = @transform_3, window_bounds = array<i64: 8, 1>}, {transform_indices = @transform_4, window_bounds = array<i64: 8, 1>}, {transform_indices = @transform_5, window_bounds = array<i64: 8, 1>}, {transform_indices = @transform_6, window_bounds = array<i64: 8, 1>}]} {
    %c0_i32 = arith.constant 0 : i32
    %0 = arith.cmpi eq, %arg1, %c0_i32 : i32
    %1 = arith.extui %0 : i1 to i32
    %c0_i32_0 = arith.constant 0 : i32
    %2 = arith.cmpi ne, %1, %c0_i32_0 : i32
    scf.if %2 {
      %c0_17 = arith.constant 0 : index
      %c0_18 = arith.constant 0 : index
      %35 = vector.load %arg2[%c0_17, %c0_18] : memref<8x256xf32, #tpu.memory_space<vmem>>, vector<8x128xf32>
      %c0_19 = arith.constant 0 : index
      %c0_20 = arith.constant 0 : index
      %36 = vector.load %arg3[%c0_19, %c0_20] : memref<8x256xf32, #tpu.memory_space<vmem>>, vector<8x128xf32>
      %37 = vector.extract_strided_slice %35 {offsets = [0, 0], sizes = [8, 1], strides = [1, 1]} : vector<8x128xf32> to vector<8x1xf32>
      %38 = vector.shape_cast %37 : vector<8x1xf32> to vector<8x1xf32>
      %39 = vector.broadcast %38 : vector<8x1xf32> to vector<8x128xf32>
      %c0_21 = arith.constant 0 : index
      %c0_22 = arith.constant 0 : index
      %40 = vector.load %arg9[%c0_21, %c0_22] : memref<8x128xf32, #tpu.memory_space<vmem>>, vector<8x128xf32>
      tpu.vector_store %arg9[%c0_21, %c0_22], %39 {strides = array<i32>} : memref<8x128xf32, #tpu.memory_space<vmem>>, vector<8x128xf32>,
      %41 = vector.extract_strided_slice %36 {offsets = [0, 0], sizes = [8, 1], strides = [1, 1]} : vector<8x128xf32> to vector<8x1xf32>
      %42 = vector.shape_cast %41 : vector<8x1xf32> to vector<8x1xf32>
      %43 = vector.broadcast %42 : vector<8x1xf32> to vector<8x128xf32>
      %c0_23 = arith.constant 0 : index
      %c0_24 = arith.constant 0 : index
      %44 = vector.load %arg10[%c0_23, %c0_24] : memref<8x128xf32, #tpu.memory_space<vmem>>, vector<8x128xf32>
      tpu.vector_store %arg10[%c0_23, %c0_24], %43 {strides = array<i32>} : memref<8x128xf32, #tpu.memory_space<vmem>>, vector<8x128xf32>,
    } else {
    }
    %c0 = arith.constant 0 : index
    %c0_1 = arith.constant 0 : index
    %3 = vector.load %arg9[%c0, %c0_1] : memref<8x128xf32, #tpu.memory_space<vmem>>, vector<8x128xf32>
    %c0_2 = arith.constant 0 : index
    %c0_3 = arith.constant 0 : index
    %4 = vector.load %arg10[%c0_2, %c0_3] : memref<8x128xf32, #tpu.memory_space<vmem>>, vector<8x128xf32>
    %c0_4 = arith.constant 0 : index
    %c0_5 = arith.constant 0 : index
    %5 = vector.load %arg2[%c0_4, %c0_5] : memref<8x256xf32, #tpu.memory_space<vmem>>, vector<8x128xf32>
    %c0_6 = arith.constant 0 : index
    %c0_7 = arith.constant 0 : index
    %6 = vector.load %arg3[%c0_6, %c0_7] : memref<8x256xf32, #tpu.memory_space<vmem>>, vector<8x128xf32>
    %7 = arith.subf %5, %6 : vector<8x128xf32>
    %8 = arith.subf %5, %3 : vector<8x128xf32>
    %9 = arith.subf %6, %4 : vector<8x128xf32>
    %10 = arith.mulf %8, %8 : vector<8x128xf32>
    %11 = arith.mulf %9, %9 : vector<8x128xf32>
    %12 = arith.mulf %7, %7 : vector<8x128xf32>
    %c0_8 = arith.constant 0 : index
    %c128 = arith.constant 128 : index
    %13 = vector.load %arg2[%c0_8, %c128] : memref<8x256xf32, #tpu.memory_space<vmem>>, vector<8x128xf32>
    %c0_9 = arith.constant 0 : index
    %c128_10 = arith.constant 128 : index
    %14 = vector.load %arg3[%c0_9, %c128_10] : memref<8x256xf32, #tpu.memory_space<vmem>>, vector<8x128xf32>
    %15 = arith.subf %13, %14 : vector<8x128xf32>
    %16 = arith.subf %13, %3 : vector<8x128xf32>
    %17 = arith.subf %14, %4 : vector<8x128xf32>
    %18 = arith.mulf %16, %16 : vector<8x128xf32>
    %19 = arith.mulf %17, %17 : vector<8x128xf32>
    %20 = arith.mulf %15, %15 : vector<8x128xf32>
    %21 = arith.addf %8, %16 : vector<8x128xf32>
    %22 = arith.addf %10, %18 : vector<8x128xf32>
    %23 = arith.addf %9, %17 : vector<8x128xf32>
    %24 = arith.addf %11, %19 : vector<8x128xf32>
    %25 = arith.addf %12, %20 : vector<8x128xf32>
    %c0_i32_11 = arith.constant 0 : i32
    %26 = arith.cmpi eq, %arg1, %c0_i32_11 : i32
    %27 = arith.extui %26 : i1 to i32
    %c0_i32_12 = arith.constant 0 : i32
    %28 = arith.cmpi ne, %27, %c0_i32_12 : i32
    scf.if %28 {
      %c0_17 = arith.constant 0 : index
      %c0_18 = arith.constant 0 : index
      %35 = vector.load %arg11[%c0_17, %c0_18] : memref<8x128xf32, #tpu.memory_space<vmem>>, vector<8x128xf32>
      tpu.vector_store %arg11[%c0_17, %c0_18], %21 {strides = array<i32>} : memref<8x128xf32, #tpu.memory_space<vmem>>, vector<8x128xf32>,
      %c0_19 = arith.constant 0 : index
      %c0_20 = arith.constant 0 : index
      %36 = vector.load %arg12[%c0_19, %c0_20] : memref<8x128xf32, #tpu.memory_space<vmem>>, vector<8x128xf32>
      tpu.vector_store %arg12[%c0_19, %c0_20], %22 {strides = array<i32>} : memref<8x128xf32, #tpu.memory_space<vmem>>, vector<8x128xf32>,
      %c0_21 = arith.constant 0 : index
      %c0_22 = arith.constant 0 : index
      %37 = vector.load %arg13[%c0_21, %c0_22] : memref<8x128xf32, #tpu.memory_space<vmem>>, vector<8x128xf32>
      tpu.vector_store %arg13[%c0_21, %c0_22], %23 {strides = array<i32>} : memref<8x128xf32, #tpu.memory_space<vmem>>, vector<8x128xf32>,
      %c0_23 = arith.constant 0 : index
      %c0_24 = arith.constant 0 : index
      %38 = vector.load %arg14[%c0_23, %c0_24] : memref<8x128xf32, #tpu.memory_space<vmem>>, vector<8x128xf32>
      tpu.vector_store %arg14[%c0_23, %c0_24], %24 {strides = array<i32>} : memref<8x128xf32, #tpu.memory_space<vmem>>, vector<8x128xf32>,
      %c0_25 = arith.constant 0 : index
      %c0_26 = arith.constant 0 : index
      %39 = vector.load %arg15[%c0_25, %c0_26] : memref<8x128xf32, #tpu.memory_space<vmem>>, vector<8x128xf32>
      tpu.vector_store %arg15[%c0_25, %c0_26], %25 {strides = array<i32>} : memref<8x128xf32, #tpu.memory_space<vmem>>, vector<8x128xf32>,
    } else {
    }
    %c0_i32_13 = arith.constant 0 : i32
    %29 = arith.cmpi ne, %arg1, %c0_i32_13 : i32
    %30 = arith.extui %29 : i1 to i32
    %c0_i32_14 = arith.constant 0 : i32
    %31 = arith.cmpi ne, %30, %c0_i32_14 : i32
    scf.if %31 {
      %c0_17 = arith.constant 0 : index
      %c0_18 = arith.constant 0 : index
      %35 = vector.load %arg11[%c0_17, %c0_18] : memref<8x128xf32, #tpu.memory_space<vmem>>, vector<8x128xf32>
      %36 = arith.addf %35, %21 : vector<8x128xf32>
      %c0_19 = arith.constant 0 : index
      %c0_20 = arith.constant 0 : index
      %37 = vector.load %arg11[%c0_19, %c0_20] : memref<8x128xf32, #tpu.memory_space<vmem>>, vector<8x128xf32>
      tpu.vector_store %arg11[%c0_19, %c0_20], %36 {strides = array<i32>} : memref<8x128xf32, #tpu.memory_space<vmem>>, vector<8x128xf32>,
      %c0_21 = arith.constant 0 : index
      %c0_22 = arith.constant 0 : index
      %38 = vector.load %arg12[%c0_21, %c0_22] : memref<8x128xf32, #tpu.memory_space<vmem>>, vector<8x128xf32>
      %39 = arith.addf %38, %22 : vector<8x128xf32>
      %c0_23 = arith.constant 0 : index
      %c0_24 = arith.constant 0 : index
      %40 = vector.load %arg12[%c0_23, %c0_24] : memref<8x128xf32, #tpu.memory_space<vmem>>, vector<8x128xf32>
      tpu.vector_store %arg12[%c0_23, %c0_24], %39 {strides = array<i32>} : memref<8x128xf32, #tpu.memory_space<vmem>>, vector<8x128xf32>,
      %c0_25 = arith.constant 0 : index
      %c0_26 = arith.constant 0 : index
      %41 = vector.load %arg13[%c0_25, %c0_26] : memref<8x128xf32, #tpu.memory_space<vmem>>, vector<8x128xf32>
      %42 = arith.addf %41, %23 : vector<8x128xf32>
      %c0_27 = arith.constant 0 : index
      %c0_28 = arith.constant 0 : index
      %43 = vector.load %arg13[%c0_27, %c0_28] : memref<8x128xf32, #tpu.memory_space<vmem>>, vector<8x128xf32>
      tpu.vector_store %arg13[%c0_27, %c0_28], %42 {strides = array<i32>} : memref<8x128xf32, #tpu.memory_space<vmem>>, vector<8x128xf32>,
      %c0_29 = arith.constant 0 : index
      %c0_30 = arith.constant 0 : index
      %44 = vector.load %arg14[%c0_29, %c0_30] : memref<8x128xf32, #tpu.memory_space<vmem>>, vector<8x128xf32>
      %45 = arith.addf %44, %24 : vector<8x128xf32>
      %c0_31 = arith.constant 0 : index
      %c0_32 = arith.constant 0 : index
      %46 = vector.load %arg14[%c0_31, %c0_32] : memref<8x128xf32, #tpu.memory_space<vmem>>, vector<8x128xf32>
      tpu.vector_store %arg14[%c0_31, %c0_32], %45 {strides = array<i32>} : memref<8x128xf32, #tpu.memory_space<vmem>>, vector<8x128xf32>,
      %c0_33 = arith.constant 0 : index
      %c0_34 = arith.constant 0 : index
      %47 = vector.load %arg15[%c0_33, %c0_34] : memref<8x128xf32, #tpu.memory_space<vmem>>, vector<8x128xf32>
      %48 = arith.addf %47, %25 : vector<8x128xf32>
      %c0_35 = arith.constant 0 : index
      %c0_36 = arith.constant 0 : index
      %49 = vector.load %arg15[%c0_35, %c0_36] : memref<8x128xf32, #tpu.memory_space<vmem>>, vector<8x128xf32>
      tpu.vector_store %arg15[%c0_35, %c0_36], %48 {strides = array<i32>} : memref<8x128xf32, #tpu.memory_space<vmem>>, vector<8x128xf32>,
    } else {
    }
    %c0_i32_15 = arith.constant 0 : i32
    %32 = arith.cmpi eq, %arg1, %c0_i32_15 : i32
    %33 = arith.extui %32 : i1 to i32
    %c0_i32_16 = arith.constant 0 : i32
    %34 = arith.cmpi ne, %33, %c0_i32_16 : i32
    scf.if %34 {
      %c0_17 = arith.constant 0 : index
      %c0_18 = arith.constant 0 : index
      %35 = vector.load %arg11[%c0_17, %c0_18] : memref<8x128xf32, #tpu.memory_space<vmem>>, vector<8x128xf32>
      %cst = arith.constant dense<0.000000e+00> : vector<8xf32>
      %36 = vector.multi_reduction <add>, %35, %cst [1] : vector<8x128xf32> to vector<8xf32>
      %37 = vector.shape_cast %36 : vector<8xf32> to vector<8x1xf32>
      %c0_19 = arith.constant 0 : index
      %c0_20 = arith.constant 0 : index
      %38 = vector.load %arg4[%c0_19, %c0_20] : memref<8x1xf32, #tpu.memory_space<vmem>>, vector<8x1xf32>
      tpu.vector_store %arg4[%c0_19, %c0_20], %37 {strides = array<i32>} : memref<8x1xf32, #tpu.memory_space<vmem>>, vector<8x1xf32>,
      %c0_21 = arith.constant 0 : index
      %c0_22 = arith.constant 0 : index
      %39 = vector.load %arg12[%c0_21, %c0_22] : memref<8x128xf32, #tpu.memory_space<vmem>>, vector<8x128xf32>
      %cst_23 = arith.constant dense<0.000000e+00> : vector<8xf32>
      %40 = vector.multi_reduction <add>, %39, %cst_23 [1] : vector<8x128xf32> to vector<8xf32>
      %41 = vector.shape_cast %40 : vector<8xf32> to vector<8x1xf32>
      %c0_24 = arith.constant 0 : index
      %c0_25 = arith.constant 0 : index
      %42 = vector.load %arg5[%c0_24, %c0_25] : memref<8x1xf32, #tpu.memory_space<vmem>>, vector<8x1xf32>
      tpu.vector_store %arg5[%c0_24, %c0_25], %41 {strides = array<i32>} : memref<8x1xf32, #tpu.memory_space<vmem>>, vector<8x1xf32>,
      %c0_26 = arith.constant 0 : index
      %c0_27 = arith.constant 0 : index
      %43 = vector.load %arg13[%c0_26, %c0_27] : memref<8x128xf32, #tpu.memory_space<vmem>>, vector<8x128xf32>
      %cst_28 = arith.constant dense<0.000000e+00> : vector<8xf32>
      %44 = vector.multi_reduction <add>, %43, %cst_28 [1] : vector<8x128xf32> to vector<8xf32>
      %45 = vector.shape_cast %44 : vector<8xf32> to vector<8x1xf32>
      %c0_29 = arith.constant 0 : index
      %c0_30 = arith.constant 0 : index
      %46 = vector.load %arg6[%c0_29, %c0_30] : memref<8x1xf32, #tpu.memory_space<vmem>>, vector<8x1xf32>
      tpu.vector_store %arg6[%c0_29, %c0_30], %45 {strides = array<i32>} : memref<8x1xf32, #tpu.memory_space<vmem>>, vector<8x1xf32>,
      %c0_31 = arith.constant 0 : index
      %c0_32 = arith.constant 0 : index
      %47 = vector.load %arg14[%c0_31, %c0_32] : memref<8x128xf32, #tpu.memory_space<vmem>>, vector<8x128xf32>
      %cst_33 = arith.constant dense<0.000000e+00> : vector<8xf32>
      %48 = vector.multi_reduction <add>, %47, %cst_33 [1] : vector<8x128xf32> to vector<8xf32>
      %49 = vector.shape_cast %48 : vector<8xf32> to vector<8x1xf32>
      %c0_34 = arith.constant 0 : index
      %c0_35 = arith.constant 0 : index
      %50 = vector.load %arg7[%c0_34, %c0_35] : memref<8x1xf32, #tpu.memory_space<vmem>>, vector<8x1xf32>
      tpu.vector_store %arg7[%c0_34, %c0_35], %49 {strides = array<i32>} : memref<8x1xf32, #tpu.memory_space<vmem>>, vector<8x1xf32>,
      %c0_36 = arith.constant 0 : index
      %c0_37 = arith.constant 0 : index
      %51 = vector.load %arg15[%c0_36, %c0_37] : memref<8x128xf32, #tpu.memory_space<vmem>>, vector<8x128xf32>
      %cst_38 = arith.constant dense<0.000000e+00> : vector<8xf32>
      %52 = vector.multi_reduction <add>, %51, %cst_38 [1] : vector<8x128xf32> to vector<8xf32>
      %53 = vector.shape_cast %52 : vector<8xf32> to vector<8x1xf32>
      %c0_39 = arith.constant 0 : index
      %c0_40 = arith.constant 0 : index
      %54 = vector.load %arg8[%c0_39, %c0_40] : memref<8x1xf32, #tpu.memory_space<vmem>>, vector<8x1xf32>
      tpu.vector_store %arg8[%c0_39, %c0_40], %53 {strides = array<i32>} : memref<8x1xf32, #tpu.memory_space<vmem>>, vector<8x1xf32>,
    } else {
    }
    return
  }
  func.func @transform_0(%arg0: i32, %arg1: i32) -> (i32, i32) {
    %c0_i32 = arith.constant 0 : i32
    return %arg0, %arg1 : i32, i32
  }
  func.func @transform_1(%arg0: i32, %arg1: i32) -> (i32, i32) {
    %c0_i32 = arith.constant 0 : i32
    return %arg0, %arg1 : i32, i32
  }
  func.func @transform_2(%arg0: i32, %arg1: i32) -> (i32, i32) {
    %c0_i32 = arith.constant 0 : i32
    %c0_i32_0 = arith.constant 0 : i32
    return %arg0, %c0_i32 : i32, i32
  }
  func.func @transform_3(%arg0: i32, %arg1: i32) -> (i32, i32) {
    %c0_i32 = arith.constant 0 : i32
    %c0_i32_0 = arith.constant 0 : i32
    return %arg0, %c0_i32 : i32, i32
  }
  func.func @transform_4(%arg0: i32, %arg1: i32) -> (i32, i32) {
    %c0_i32 = arith.constant 0 : i32
    %c0_i32_0 = arith.constant 0 : i32
    return %arg0, %c0_i32 : i32, i32
  }
  func.func @transform_5(%arg0: i32, %arg1: i32) -> (i32, i32) {
    %c0_i32 = arith.constant 0 : i32
    %c0_i32_0 = arith.constant 0 : i32
    return %arg0, %c0_i32 : i32, i32
  }
  func.func @transform_6(%arg0: i32, %arg1: i32) -> (i32, i32) {
    %c0_i32 = arith.constant 0 : i32
    %c0_i32_0 = arith.constant 0 : i32
    return %arg0, %c0_i32 : i32, i32
  }
}

</mosaic_0001>

<bundles_post_ra>
// kernel: volatility_loss.1
= control target key start
LH: loop header
LB: loop body
LE: loop exit
PB: predicated region body
PF: predicated region fallthrough
CT: control target
= control target key end

     0   :  { %12 = vsyncpa [#allocation10], 0  ;;  %s1109_s0 = inlined_call_operand.hbm [shape: f32[16,256], index: 0, kind: input, shape index: {}]   ;;  %s1110_s1 = inlined_call_operand.hbm [shape: f32[16,256], index: 1, kind: input, shape index: {}]   ;;  %s1111_s2 = inlined_call_operand.vmem [shape: f32[16,1], index: 2, kind: output, shape index: {0}]   ;;  %s1112_s3 = inlined_call_operand.vmem [shape: f32[16,1], index: 3, kind: output, shape index: {1}]   ;;  %s1113_s4 = inlined_call_operand.vmem [shape: f32[16,1], index: 4, kind: output, shape index: {2}]   ;;  %s1114_s5 = inlined_call_operand.vmem [shape: f32[16,1], index: 5, kind: output, shape index: {3}]   ;;  %s1115_s6 = inlined_call_operand.vmem [shape: f32[16,1], index: 6, kind: output, shape index: {4}]  }
   0x1   :  { %14 = vsyncpa [#allocation10 + $0x1], 0 }
   0x2   :  { %15 = vsyncpa [#allocation12], 0 }
   0x3   :  { %17 = vsyncpa [#allocation12 + $0x1], 0  ;;  %s925_s21 = smov 0   ;;  %s927_s22 = smov 0  }
   0x4   :  { %s929_s23 = smov 0   ;;  %s931_s24 = smov 0  }
   0x5   :  { %s933_s25 = smov 0   ;;  %s935_s26 = smov 0  }
   0x6 LB: > { %s687_s27 = sadd.s32 4294967295, %s885_s26   ;;  %s35_s28 = sadd.s32 1, %s881_s25  ;;  %s885_s26 = sphi %s935_s26, %s23_s26   ;;  %s881_s25 = sphi %s933_s25, %s1129_s25   ;;  %s877_s24 = sphi %s931_s24, %s1128_s24   ;;  %s873_s23 = sphi %s929_s23, %s1127_s23   ;;  %s869_s22 = sphi %s927_s22, %s1126_s22   ;;  %s865_s21 = sphi %s925_s21, %s1125_s21  }
   0x7   : > { %p37_p0 = scmp.ge.s32.totalorder %s35_s28, 2  ;;  %s44_s29 = sadd.s32 1, %s873_s23 }
   0x8   : > { %p51_p1 = scmp.ne.s32.totalorder %s873_s23, %s869_s22  ;;  %p52_p2 = scmp.eq.s32.totalorder %s885_s26, 0 }
   0x9   : > { %s1131_s28 = smov (%p37_p0, %s35_s28), 0  ;;  %p57_p4 = scmp.ne.s32.totalorder %s869_s22, %s865_s21 }
   0xa   : > { %p961_p3 = por %p52_p2, %p51_p1  ;;  %s39_s7 = ssub.s32 %s881_s25, %s1131_s28 }
   0xb   : > { %p58_p5 = scmp.eq.s32.totalorder %s687_s27, 0  ;;  %p42_p6 = scmp.eq.s32.totalorder %s39_s7, 0 }
   0xc   : > { %p720_p8 = scmp.lt.s32.totalorder %s885_s26, 2  ;;  %s977_s10 = sand.u32 1, %s873_s23  }
   0xd   : > { %p968_p7 = por %p58_p5, %p57_p4  ;;  %s707_s11 = sshll.u32 %s881_s25, 8 }
   0xe   : > { %s974_s9 = scalar_select %p42_p6, %s873_s23, %s44_s29  }
   0xf   : > { %s1118_s8 = scalar_select %p968_p7, 1, 0 }
  0x10   : > { %s691_s12 = sshll.u32 %s977_s10, 4  ;;  %s986_s15 = scalar_lea.hbm %s1109_s0, %s707_s11 }
  0x11   : > { %s243_s16 = scalar_lea.vmem [#allocation9], %s691_s12  ;;  %p992_p9 = pnand %p720_p8, %p961_p3 }
  0x12   : > { %s253_s17 = sshll.u32 %s243_s16, 4  ;;  %s240_s19 = scalar_lea.sflag [#allocation10], %s977_s10  ;;  %s996_s17 = int_to_ptr.vmem [resolvable:$true] %s253_s17 }
  0x13   : > { %s771_s20 = scalar_lea.hbm %s986_s15, 256  ;;  %p773_p13 = pneg %p992_p9 }
  0x14   : > { %p772_p12 = scmp.ne.s32.totalorder %s986_s15, %s771_s20  ;;  %s776_s29 = scalar_lea.hbm %s1109_s0, 512 }
  0x15   : > { %p777_p2 = scmp.lt.u32.totalorder %s986_s15, %s1109_s0  ;;  %p778_p3 = scmp.lt.u32.totalorder %s776_s29, %s771_s20 }
  0x16   : > { %p774_p0 = pnand %p773_p13, %p772_p12  ;;  %p780_p5 = scmp.lt.u32.totalorder %s771_s20, %s986_s15 }
  0x17   : > { %p779_p4 = por %p778_p3, %p777_p2 }
  0x18   : > { %p775_p1 = pneg %p774_p0 }
  0x19   : > { %p781_p6 = por %p780_p5, %p779_p4 }
  0x1b   : > { %p782_p8 = pnand %p781_p6, %p775_p1 }
  0x1d   : > { %785 = shalt.err (!%p782_p8)
}
  0x1e   : > { %s786_s13 = scalar_lea.vmem %s996_s17, 256  ;;  %s887_s14 = smov [#allocation9]  }
  0x1f   : > { %p787_p12 = scmp.ne.s32.totalorder %s996_s17, %s786_s13  ;;  %s791_s16 = sshll.u32 %s887_s14, 4  ;;  %s792_s16 = int_to_ptr.vmem [resolvable:$false] %s791_s16 }
  0x20   : > { %s793_s21 = scalar_lea.vmem %s792_s16, 512  ;;  %p794_p11 = scmp.lt.s32.totalorder %s996_s17, %s792_s16 }
  0x21   : > { %p789_p0 = pnand %p787_p12, %p773_p13  ;;  %p795_p2 = scmp.lt.s32.totalorder %s793_s21, %s786_s13 }
  0x23   : > { %p790_p10 = pneg %p789_p0  ;;  %p796_p3 = por %p795_p2, %p794_p11 }
  0x25   : > { %p797_p4 = pnand %p796_p3, %p790_p10 }
  0x27   : > { %800 = shalt.err (!%p797_p4)
}
  0x28   : > { %716 = dma.hbm_to_vmem [thread:$0]  (!%p992_p9), %s986_s15, 256, %s996_s17, %s240_s19  }
  0x29   : > { %p1120_p1 = scmp.lt.s32.totalorder %s885_s26, 3  ;;  %p1121_p5 = scmp.ge.s32.totalorder %s885_s26, 1 }
  0x2a   : > { %s1039_s30 = scalar_lea.hbm %s1110_s1, %s707_s11  ;;  %s264_s7 = scalar_lea.vmem [#allocation11], %s691_s12 }
  0x2b   : > { %p1030_p6 = pnand %p1121_p5, %p1120_p1  ;;  %s274_s13 = sshll.u32 %s264_s7, 4  ;;  %s275_s13 = int_to_ptr.vmem [resolvable:$true] %s274_s13 }
  0x2c   : > { %s261_s15 = scalar_lea.sflag [#allocation12], %s977_s10  ;;  %s801_s17 = scalar_lea.hbm %s1039_s30, 256 }
  0x2d   : > { %s1122_s20 = scalar_select %p1030_p6, 1, 0 }
  0x2e   : > { %p802_p10 = scmp.ne.s32.totalorder %s1039_s30, %s801_s17  ;;  %s806_s11 = scalar_lea.hbm %s1110_s1, 512 }
  0x2f   : > { %p807_p12 = scmp.lt.u32.totalorder %s1039_s30, %s1110_s1  ;;  %p808_p0 = scmp.lt.u32.totalorder %s806_s11, %s801_s17 }
  0x30   : > { %p804_p11 = pnand %p802_p10, %p773_p13  ;;  %p810_p3 = scmp.lt.u32.totalorder %s801_s17, %s1039_s30 }
  0x31   : > { %p809_p2 = por %p808_p0, %p807_p12 }
  0x32   : > { %p805_p8 = pneg %p804_p11 }
  0x33   : > { %p811_p4 = por %p810_p3, %p809_p2 }
  0x35   : > { %p812_p1 = pnand %p811_p4, %p805_p8 }
  0x37   : > { %815 = shalt.err (!%p812_p1)
}
  0x38   : > { %s816_s10 = scalar_lea.vmem %s275_s13, 256  ;;  %s888_s12 = smov [#allocation11]  }
  0x39   : > { %p817_p5 = scmp.ne.s32.totalorder %s275_s13, %s816_s10  ;;  %s821_s27 = sshll.u32 %s888_s12, 4  ;;  %s822_s27 = int_to_ptr.vmem [resolvable:$false] %s821_s27 }
  0x3a   : > { %s823_s29 = scalar_lea.vmem %s822_s27, 512  ;;  %p824_p7 = scmp.lt.s32.totalorder %s275_s13, %s822_s27 }
  0x3b   : > { %p819_p10 = pnand %p817_p5, %p773_p13  ;;  %p825_p6 = scmp.lt.s32.totalorder %s823_s29, %s816_s10 }
  0x3d   : > { %p820_p11 = pneg %p819_p10  ;;  %p826_p0 = por %p825_p6, %p824_p7 }
  0x3f   : > { %p827_p12 = pnand %p826_p0, %p820_p11 }
  0x41   : > { %830 = shalt.err (!%p827_p12)
}
  0x42   : > { %719 = dma.hbm_to_vmem [thread:$0]  (!%p992_p9), %s1039_s30, 256, %s275_s13, %s261_s15  }
  0x43   : > { %p1123_p8 = scmp.ne.s32.totalorder %s1122_s20, 0 }
  0x44   : > { %s285_s7 = sand.u32 (!%p1123_p8), 1, %s869_s22   ;;  %p1124_p13 = scmp.ne.s32.totalorder (!%p1123_p8), %s1118_s8, 0 }
  0x45   : > { %283 = sbr.rel (%p1123_p8) target bundleno = 368 (0x170), region = 28  ;;  %s698_s17 = sshll.u32 (!%p1123_p8), %s285_s7, 4 }
  0x46   : > { %s286_s19 = scalar_lea.sflag (!%p1123_p8), [#allocation10], %s285_s7  ;;  %s289_s14 = scalar_lea.vmem (!%p1123_p8), [#allocation9], %s698_s17 }
  0x4c   : > { %856 = dma.done.wait (%p1124_p13), %s286_s19, 256  }
  0x4d   : > { %858 = vsyncadd (%p1124_p13), %s286_s19, 4294967040  ;;  %s295_s11 = scalar_lea.sflag [#allocation12], %s285_s7  ;;  %s298_s16 = scalar_lea.vmem [#allocation11], %s698_s17 }
  0x4e   : > { %860 = dma.done.wait (%p1124_p13), %s295_s11, 256  }
  0x4f   : > { %862 = vsyncadd (%p1124_p13), %s295_s11, 4294967040  ;;  %v889_v0 = vmov 0   ;;  %v373_v1 = vld [vmem:[%s289_s14] sm:$0xff]  ;;  %v397_v3 = vld [vmem:[%s289_s14 + $0x8] sm:$0xff]  ;;  %p349_p7 = scmp.lt.s32.totalorder %s877_s24, 1  ;;  %vm443_vm0 = vcmask 7168  }
  0x50   : > { %770 = vset.pattern.permute.xlu0 %v889_v0  ;;  %v374_v2 = vld [vmem:[%s298_s16] sm:$0xff]  ;;  %v398_v7 = vld [vmem:[%s298_s16 + $0x8] sm:$0xff] }
  0x51   : > { %377 = vperm.xlu0 %770, %v373_v1   ;;  %v391_v12 = vsub.f32 %v373_v1, %v374_v2  ;;  %v399_v13 = vsub.f32 %v397_v3, %v398_v7  ;;  %s1133_s24 = smov (!%p349_p7, %s877_s24), 1 }
  0x52   : > { %s700_s8 = sshll.u32 %s1133_s24, 3 }
  0x53   : > { %v396_v20 = vmul.f32 %v391_v12, %v391_v12  ;;  %v404_v21 = vmul.f32 %v399_v13, %v399_v13  ;;  %s352_s30 = scalar_lea.vmem %s1111_s2, %s700_s8  ;;  %s356_s21 = scalar_lea.vmem %s1112_s3, %s700_s8 }
  0x54   : > { %s360_s27 = scalar_lea.vmem %s1113_s4, %s700_s8  ;;  %s364_s7 = scalar_lea.vmem %s1114_s5, %s700_s8 }
  0x55   : > { %383 = vperm.xlu0 %770, %v374_v2   ;;  %v409_v23 = vadd.f32 %v404_v21, %v396_v20  ;;  %s368_s14 = scalar_lea.vmem %s1115_s6, %s700_s8 }
  0xd0   : > { %v378_v4 = vpop.permute.xlu0 %377 }
  0xd1   : > { %v392_v5 = vsub.f32 %v373_v1, %v378_v4  ;;  %v400_v6 = vsub.f32 %v397_v3, %v378_v4 }
  0xd3   : > { %v405_v8 = vadd.f32 %v400_v6, %v392_v5  ;;  %v394_v9 = vmul.f32 %v392_v5, %v392_v5  ;;  %v402_v10 = vmul.f32 %v400_v6, %v400_v6 }
  0xd4   : > { %v384_v11 = vpop.permute.xlu0 %383 }
  0xd5   : > { %v393_v14 = vsub.f32 %v374_v2, %v384_v11  ;;  %v401_v15 = vsub.f32 %v398_v7, %v384_v11  ;;  %441 = vadd.xlane.f32.xlu1 %v405_v8  ;;  %v406_v16 = vadd.f32 %v402_v10, %v394_v9 }
  0xd7   : > { %v407_v17 = vadd.f32 %v401_v15, %v393_v14  ;;  %v395_v18 = vmul.f32 %v393_v14, %v393_v14  ;;  %v403_v19 = vmul.f32 %v401_v15, %v401_v15 }
  0xd9   : > { %446 = vadd.xlane.f32.xlu1 %v406_v16  ;;  %450 = vadd.xlane.f32.xlu0 %v407_v17  ;;  %v408_v22 = vadd.f32 %v403_v19, %v395_v18 }
  0xdd   : > { %454 = vadd.xlane.f32.xlu1 %v408_v22 }
  0xe1   : > { %458 = vadd.xlane.f32.xlu1 %v409_v23 }
 0x162   : > { %v442_v24 = vpop.xlane.xlu1 %441 }
 0x163   : > { %444 = vst.msk [vmem:[%s352_s30] sm:$0xff] %vm443_vm0, %v442_v24 }
 0x166   : > { %v447_v25 = vpop.xlane.xlu1 %446  ;;  %v451_v26 = vpop.xlane.xlu0 %450 }
 0x167   : > { %448 = vst.msk [vmem:[%s356_s21] sm:$0xff] %vm443_vm0, %v447_v25  ;;  %452 = vst.msk [vmem:[%s360_s27] sm:$0xff] %vm443_vm0, %v451_v26 }
 0x16a   : > { %v455_v27 = vpop.xlane.xlu1 %454 }
 0x16b   : > { %456 = vst.msk [vmem:[%s364_s7] sm:$0xff] %vm443_vm0, %v455_v27 }
 0x16e   : > { %v459_v28 = vpop.xlane.xlu1 %458 }
 0x16f   : > { %460 = vst.msk [vmem:[%s368_s14] sm:$0xff] %vm443_vm0, %v459_v28 }
 0x170 PF: > { %s23_s26 = sadd.s32 1, %s885_s26   ;;  %s1125_s21 = smov %s869_s22 }
 0x171   : > { %p20_p9 = scmp.ge.s32.totalorder %s23_s26, 4   ;;  %s1126_s22 = smov %s873_s23 }
 0x172   : > { %s1127_s23 = smov %s974_s9  ;;  %s1128_s24 = smov %s881_s25 }
 0x173   : > { %s1129_s25 = smov %s1131_s28  ;;  %22 = sbr.rel (!%p20_p9) target bundleno = 6 (0x6), region = 145 }
 0x17a   :  { %536 = vsyncpa [#allocation10], 1 }
 0x17b   :  { %538 = vsyncpa [#allocation10 + $0x1], 1 }
 0x17c   :  { %539 = vsyncpa [#allocation12], 1 }
 0x17d   :  { %541 = vsyncpa [#allocation12 + $0x1], 1 }

</bundles_post_ra>
